<compile_context>
chip_gen: v5e
topology: v5e:2x2
jax: 0.10.0
libtpu: 0.0.40
codegen_flags: <defaults>
</compile_context>

<pallas_src>
import jax
import jax.numpy as jnp
from jax import lax
from jax.experimental import pallas as pl
from jax.experimental.pallas import tpu as pltpu


# ---------------------------------------------------------------------------
# Pallas kernels
# ---------------------------------------------------------------------------
def _to_rgb_kernel(x_ref, w_ref, b_ref, out_ref):
    # x_ref: (C_in, TN)  w_ref: (3, C_in)  b_ref: (3, 1)  out_ref: (3, TN)
    out = jnp.dot(w_ref[...], x_ref[...], preferred_element_type=jnp.float32)
    out_ref[...] = (out + b_ref[...]).astype(out_ref.dtype)


def _to_rgb_skip_kernel(x_ref, w_ref, b_ref, skip_ref, out_ref):
    # Same as above, with the (already upsampled if needed) skip fused in.
    out = jnp.dot(w_ref[...], x_ref[...], preferred_element_type=jnp.float32)
    out = out + b_ref[...] + skip_ref[...].astype(jnp.float32)
    out_ref[...] = out.astype(out_ref.dtype)


# ---------------------------------------------------------------------------
# Blur upsample (blocks.Upsample, StyleGAN2-style upfirdn2d [1,3,3,1], x2)
# ---------------------------------------------------------------------------
def _upsample_1d_2x(a, axis):
    """Exact polyphase form of upfirdn2d(up=2, pad=(2,1)) with k=[1,3,3,1]/4.

      y[2i]   = (x[i-1] + 3*x[i]) / 4
      y[2i+1] = (3*x[i] + x[i+1]) / 4        (zero padding at the borders)
    """
    axis = axis % a.ndim
    n = a.shape[axis]
    zshape = list(a.shape)
    zshape[axis] = 1
    z = jnp.zeros(zshape, a.dtype)
    prev = jnp.concatenate([z, lax.slice_in_dim(a, 0, n - 1, axis=axis)], axis=axis)
    nxt = jnp.concatenate([lax.slice_in_dim(a, 1, n, axis=axis), z], axis=axis)
    even = (prev + 3.0 * a) * 0.25
    odd = (3.0 * a + nxt) * 0.25
    out = jnp.stack([even, odd], axis=axis + 1)
    new_shape = list(a.shape)
    new_shape[axis] = 2 * n
    return out.reshape(new_shape)


def _blur_upsample_2x(x):
    """(B, C, H, W) -> (B, C, 2H, 2W), separable [1,3,3,1] blur upsample."""
    x = _upsample_1d_2x(x, axis=-1)
    x = _upsample_1d_2x(x, axis=-2)
    return x


# ---------------------------------------------------------------------------
# Wrapper
# ---------------------------------------------------------------------------
def to_rgb_forward(x, conv_weight, conv_bias, rgb_bias, skip=None, upsample=True):
    """ToRGB.forward.

    Args:
      x:           (B, C_in, H, W) activations.
      conv_weight: (3, C_in, 1, 1) 1x1-conv weight.
      conv_bias:   (3,) conv bias.
      rgb_bias:    (1, 3, 1, 1) learned RGB bias (self.bias).
      skip:        optional skip. If `upsample`, shape (B, 3, H//2, W//2),
                   else (B, 3, H, W).
      upsample:    whether a given skip must be blur-upsampled first.
    Returns:
      (B, 3, H, W) RGB output.
    """
    B, C_in, H, W = x.shape
    HW = H * W
    dtype = x.dtype

    # Free reshape (no transpose): channels on sublanes, spatial on lanes.
    x3 = x.reshape(B, C_in, HW)
    w2 = conv_weight.reshape(3, C_in).astype(dtype)
    # Fold the conv bias and the learned RGB bias into a single resident operand.
    bias = (conv_bias.reshape(3, 1).astype(jnp.float32)
            + rgb_bias.reshape(3, 1).astype(jnp.float32))

    # Lane tile: multiple of 128, as big as divides HW, capped so the streamed
    # x double-buffer stays ~<=8 MiB (safe on v7x's smaller VMEM).
    itemsize = jnp.dtype(dtype).itemsize
    max_tile = (4 * 1024 * 1024) // max(C_in * itemsize, 1)
    max_tile = max(128, min(4096, (max_tile // 128) * 128))
    if HW % 128 == 0:
        tile_n = 128
        while tile_n * 2 <= max_tile and HW % (tile_n * 2) == 0:
            tile_n *= 2
    else:
        tile_n = HW  # full extent (legal for any size); odd resolutions only.
    grid = (B, HW // tile_n)

    in_specs = [
        pl.BlockSpec((None, C_in, tile_n), lambda b, i: (b, 0, i)),  # streamed x
        pl.BlockSpec((3, C_in), lambda b, i: (0, 0)),                # resident weight
        pl.BlockSpec((3, 1), lambda b, i: (0, 0)),                   # resident bias
    ]
    operands = [x3, w2, bias]
    kernel = _to_rgb_kernel

    if skip is not None:
        if upsample:
            skip = _blur_upsample_2x(skip)
        assert skip.shape == (B, 3, H, W), skip.shape
        s3 = skip.reshape(B, 3, HW)
        in_specs.append(pl.BlockSpec((None, 3, tile_n), lambda b, i: (b, 0, i)))
        operands.append(s3)
        kernel = _to_rgb_skip_kernel

    out3 = pl.pallas_call(
        kernel,
        out_shape=jax.ShapeDtypeStruct((B, 3, HW), dtype),
        grid_spec=pl.GridSpec(
            grid=grid,
            in_specs=in_specs,
            out_specs=pl.BlockSpec((None, 3, tile_n), lambda b, i: (b, 0, i)),
        ),
        compiler_params=pltpu.CompilerParams(
            dimension_semantics=("parallel", "parallel"),
        ),
    )(*operands)

    return out3.reshape(B, 3, H, W)


# ---------------------------------------------------------------------------
# Demo / self-check
# ---------------------------------------------------------------------------
if __name__ == "__main__":
    key = jax.random.PRNGKey(0)
    k_x, k_w, k_b, k_s1, k_s2 = jax.random.split(key, 5)

    batch, in_channel, size = 2, 32, 16

    x = jax.random.normal(k_x, (batch, in_channel, size, size), dtype=jnp.float32)
    conv_weight = 0.1 * jax.random.normal(k_w, (3, in_channel, 1, 1), dtype=jnp.float32)
    conv_bias = 0.1 * jax.random.normal(k_b, (3,), dtype=jnp.float32)
    rgb_bias = jnp.zeros((1, 3, 1, 1), dtype=jnp.float32)  # matches torch.zeros init
    skip_same = jax.random.normal(k_s1, (batch, 3, size, size), dtype=jnp.float32)
    skip_half = jax.random.normal(k_s2, (batch, 3, size // 2, size // 2), dtype=jnp.float32)

    def ref_conv(x, w, bc, be, skip=None):
        out = jnp.einsum("bchw,oc->bohw", x, w.reshape(3, -1),
                         precision=jax.lax.Precision.HIGHEST)
        out = out + bc.reshape(1, 3, 1, 1) + be
        if skip is not None:
            out = out + skip
        return out

    def ref_upsample(s):
        # Independent reference: upfirdn2d([1,3,3,1], up=2) as a depthwise
        # dilated conv (kernel * factor^2 / sum^2, pad (2,2) on the dilated grid).
        k1 = jnp.array([1.0, 3.0, 3.0, 1.0], dtype=jnp.float32)
        k2 = jnp.outer(k1, k1) / (k1.sum() ** 2) * 4.0
        c = s.shape[1]
        kern = jnp.tile(k2[None, None], (c, 1, 1, 1))
        return lax.conv_general_dilated(
            s, kern, window_strides=(1, 1), padding=((2, 2), (2, 2)),
            lhs_dilation=(2, 2), dimension_numbers=("NCHW", "OIHW", "NCHW"),
            feature_group_count=c, precision=jax.lax.Precision.HIGHEST)

    # Path 1: no skip.
    out1 = jax.block_until_ready(to_rgb_forward(x, conv_weight, conv_bias, rgb_bias))
    ref1 = ref_conv(x, conv_weight, conv_bias, rgb_bias)
    assert out1.shape == (batch, 3, size, size), out1.shape
    assert jnp.allclose(out1, ref1, atol=1e-4, rtol=1e-4), float(jnp.max(jnp.abs(out1 - ref1)))

    # Path 2: skip already at output resolution (is_upsample=False).
    out2 = jax.block_until_ready(
        to_rgb_forward(x, conv_weight, conv_bias, rgb_bias, skip=skip_same, upsample=False))
    ref2 = ref_conv(x, conv_weight, conv_bias, rgb_bias, skip_same)
    assert jnp.allclose(out2, ref2, atol=1e-4, rtol=1e-4), float(jnp.max(jnp.abs(out2 - ref2)))

    # Path 3: half-resolution skip, blur-upsampled (is_upsample=True).
    out3 = jax.block_until_ready(
        to_rgb_forward(x, conv_weight, conv_bias, rgb_bias, skip=skip_half, upsample=True))
    ref3 = ref_conv(x, conv_weight, conv_bias, rgb_bias, ref_upsample(skip_half))
    assert jnp.allclose(out3, ref3, atol=1e-4, rtol=1e-4), float(jnp.max(jnp.abs(out3 - ref3)))

    print("KERNEL_OK")
</pallas_src>

<mosaic_0001>
module attributes {stable_mosaic.version = 11 : i64} {
  func.func @_to_rgb_kernel(%arg0: i32, %arg1: i32, %arg2: memref<1x32x256xf32, #tpu.memory_space<vmem>>, %arg3: memref<3x32xf32, #tpu.memory_space<vmem>>, %arg4: memref<3x1xf32, #tpu.memory_space<vmem>>, %arg5: memref<1x3x256xf32, #tpu.memory_space<vmem>>) attributes {dimension_semantics = [#tpu.dimension_semantics<parallel>, #tpu.dimension_semantics<parallel>], iteration_bounds = array<i64: 2, 1>, scalar_prefetch = 0 : i64, scratch_operands = 0 : i64, tpu.core_type = #tpu.core_type<tc>, window_params = [{transform_indices = @transform_0, window_bounds = array<i64: 1, 32, 256>}, {pipeline_mode = #tpu.pipeline_mode<synchronous>, transform_indices = @transform_1, window_bounds = array<i64: 3, 32>}, {pipeline_mode = #tpu.pipeline_mode<synchronous>, transform_indices = @transform_2, window_bounds = array<i64: 3, 1>}, {transform_indices = @transform_3, window_bounds = array<i64: 1, 3, 256>}]} {
    %c0 = arith.constant 0 : index
    %c0_0 = arith.constant 0 : index
    %0 = vector.load %arg3[%c0, %c0_0] : memref<3x32xf32, #tpu.memory_space<vmem>>, vector<3x32xf32>
    %c0_1 = arith.constant 0 : index
    %c0_2 = arith.constant 0 : index
    %c0_3 = arith.constant 0 : index
    %1 = vector.load %arg2[%c0_1, %c0_2, %c0_3] : memref<1x32x256xf32, #tpu.memory_space<vmem>>, vector<1x32x256xf32>
    %2 = vector.shape_cast %1 : vector<1x32x256xf32> to vector<32x256xf32>
    %cst = arith.constant dense<0.000000e+00> : vector<3x256xf32>
    %3 = tpu.matmul %0, %2, %cst {dimension_numbers = #tpu.dot_dimension_numbers<[1], [0], [0], [1], [0, 0, 1, 1], [], []>} : vector<3x32xf32>, vector<32x256xf32>, vector<3x256xf32> -> vector<3x256xf32>
    %c0_4 = arith.constant 0 : index
    %c0_5 = arith.constant 0 : index
    %4 = vector.load %arg4[%c0_4, %c0_5] : memref<3x1xf32, #tpu.memory_space<vmem>>, vector<3x1xf32>
    %5 = vector.broadcast %4 : vector<3x1xf32> to vector<3x256xf32>
    %6 = arith.addf %3, %5 : vector<3x256xf32>
    %c0_6 = arith.constant 0 : index
    %c0_7 = arith.constant 0 : index
    %c0_8 = arith.constant 0 : index
    %7 = vector.load %arg5[%c0_6, %c0_7, %c0_8] : memref<1x3x256xf32, #tpu.memory_space<vmem>>, vector<1x3x256xf32>
    %8 = vector.shape_cast %7 : vector<1x3x256xf32> to vector<3x256xf32>
    %9 = vector.shape_cast %6 : vector<3x256xf32> to vector<1x3x256xf32>
    tpu.vector_store %arg5[%c0_6, %c0_7, %c0_8], %9 {strides = array<i32>} : memref<1x3x256xf32, #tpu.memory_space<vmem>>, vector<1x3x256xf32>,
    return
  }
  func.func @transform_0(%arg0: i32, %arg1: i32) -> (i32, i32, i32) {
    %c0_i32 = arith.constant 0 : i32
    %c0_i32_0 = arith.constant 0 : i32
    return %arg0, %c0_i32, %arg1 : i32, i32, i32
  }
  func.func @transform_1(%arg0: i32, %arg1: i32) -> (i32, i32) {
    %c0_i32 = arith.constant 0 : i32
    %c0_i32_0 = arith.constant 0 : i32
    %c0_i32_1 = arith.constant 0 : i32
    return %c0_i32, %c0_i32_0 : i32, i32
  }
  func.func @transform_2(%arg0: i32, %arg1: i32) -> (i32, i32) {
    %c0_i32 = arith.constant 0 : i32
    %c0_i32_0 = arith.constant 0 : i32
    %c0_i32_1 = arith.constant 0 : i32
    return %c0_i32, %c0_i32_0 : i32, i32
  }
  func.func @transform_3(%arg0: i32, %arg1: i32) -> (i32, i32, i32) {
    %c0_i32 = arith.constant 0 : i32
    %c0_i32_0 = arith.constant 0 : i32
    return %arg0, %c0_i32, %arg1 : i32, i32, i32
  }
}

</mosaic_0001>

<bundles_post_ra>
// kernel: tpu_custom_call.1
= control target key start
LH: loop header
LB: loop body
LE: loop exit
PB: predicated region body
PF: predicated region fallthrough
CT: control target
= control target key end

     0   :  { %8 = vsyncpa [#allocation3], 0  ;;  %s657_s0 = inlined_call_operand.hbm [shape: f32[2,32,256], index: 0, kind: input, shape index: {}]   ;;  %s658_s1 = inlined_call_operand.vmem [shape: f32[3,32], index: 1, kind: input, shape index: {}]   ;;  %s659_s2 = inlined_call_operand.vmem [shape: f32[3,1], index: 2, kind: input, shape index: {}]   ;;  %s660_s3 = inlined_call_operand.vmem [shape: f32[2,3,256], index: 3, kind: output, shape index: {}]  }
   0x1   :  { %10 = vsyncpa [#allocation3 + $0x1], 0  ;;  %s563_s12 = smov 0   ;;  %s565_s13 = smov 0  }
   0x2   :  { %s567_s14 = smov 0   ;;  %s569_s15 = smov 0  }
   0x3   :  { %s571_s16 = smov 0   ;;  %s573_s17 = smov 0  }
   0x4 LB: > { %s382_s18 = sadd.s32 4294967295, %s538_s17   ;;  %s28_s19 = sadd.s32 1, %s534_s16  ;;  %s538_s17 = sphi %s573_s17, %s16_s17   ;;  %s534_s16 = sphi %s571_s16, %s667_s16   ;;  %s530_s15 = sphi %s569_s15, %s666_s15   ;;  %s526_s14 = sphi %s567_s14, %s665_s14   ;;  %s522_s13 = sphi %s565_s13, %s664_s13   ;;  %s518_s12 = sphi %s563_s12, %s663_s12  }
   0x5   : > { %p30_p0 = scmp.ge.s32.totalorder %s28_s19, 2  ;;  %s37_s20 = sadd.s32 1, %s526_s14 }
   0x6   : > { %p44_p1 = scmp.ne.s32.totalorder %s526_s14, %s522_s13  ;;  %p45_p2 = scmp.eq.s32.totalorder %s538_s17, 0 }
   0x7   : > { %s669_s19 = smov (%p30_p0, %s28_s19), 0  ;;  %p50_p4 = scmp.ne.s32.totalorder %s522_s13, %s518_s12 }
   0x8   : > { %p599_p3 = por %p45_p2, %p44_p1  ;;  %s32_s22 = ssub.s32 %s534_s16, %s669_s19 }
   0x9   : > { %p51_p5 = scmp.eq.s32.totalorder %s382_s18, 0  ;;  %p35_p6 = scmp.eq.s32.totalorder %s32_s22, 0 }
   0xa   : > { %p405_p8 = scmp.lt.s32.totalorder %s538_s17, 2  ;;  %s150_s25 = sand.u32 1, %s526_s14  }
   0xb   : > { %p606_p7 = por %p51_p5, %p50_p4  ;;  %s397_s26 = sshll.u32 %s534_s16, 6 }
   0xc   : > { %s612_s24 = scalar_select %p35_p6, %s526_s14, %s37_s20  }
   0xd   : > { %s386_s27 = sshll.u32 %s150_s25, 6  ;;  %s161_s30 = scalar_lea.hbm %s657_s0, %s397_s26 }
   0xe   : > { %s162_s4 = sshll.u32 %s161_s30, 4  ;;  %s154_s5 = scalar_lea.vmem [#allocation2], %s386_s27  ;;  %s163_s4 = int_to_ptr.hbm [resolvable:$true] %s162_s4 }
   0xf   : > { %s164_s6 = sshll.u32 %s154_s5, 4  ;;  %p402_p9 = pnand %p405_p8, %p599_p3  ;;  %s165_s6 = int_to_ptr.vmem [resolvable:$true] %s164_s6 }
  0x10   : > { %p389_p10 = scmp.ge.s32.totalorder %s538_s17, 1  ;;  %p172_p11 = scmp.lt.s32.totalorder %s538_s17, 3 }
  0x11   : > { %s151_s7 = scalar_lea.sflag [#allocation3], %s150_s25  ;;  %s540_s8 = smov 256  }
  0x12   : > { %s541_s9 = smov 16   ;;  %p173_p12 = pnand %p389_p10, %p172_p11 }
  0x13   : > { %404 = dma.hbm_to_vmem [thread:$0]  (!%p402_p9), %s163_s4, 1024, %s165_s6, %s151_s7, %s540_s8, %s540_s8, %s541_s9  }
  0x14   : > { %176 = sbr.rel (%p173_p12) target bundleno = 167 (0xa7), region = 32  ;;  %s178_s10 = sand.u32 (!%p173_p12), 1, %s522_s13  }
  0x15   : > { %s390_s11 = sshll.u32 (!%p173_p12), %s178_s10, 6  ;;  %s179_s12 = scalar_lea.sflag (!%p173_p12), [#allocation3], %s178_s10 }
  0x16   : > { %s182_s18 = scalar_lea.vmem (!%p173_p12), [#allocation2], %s390_s11 }
  0x19   : > { %513 = dma.done.wait (%p606_p7), %s179_s12, 1024  }
  0x1a   : > { %515 = vsyncadd (%p606_p7), %s179_s12, 4294966272  ;;  %v542_v0 = vmov 0   ;;  %v228_v1 = vld [vmem:[%s182_s18 + $0x30] sm:$0xff]  ;;  %v229_v2 = vld [vmem:[%s182_s18 + $0x38] sm:$0xff]  ;;  %vm236_vm0 = vcmask 261120   ;;  %p212_p13 = scmp.lt.s32.totalorder %s530_s15, 1 }
  0x1b   : > { %457 = vset.pattern.permute.xlu0 %v542_v0  ;;  %v226_v3 = vld [vmem:[%s182_s18 + $0x20] sm:$0xff]  ;;  %252 = vmatpush.msra.mxu0 %v228_v1  ;;  %v227_v4 = vld [vmem:[%s182_s18 + $0x28] sm:$0xff]  ;;  %v224_v5 = vld [vmem:[%s182_s18 + $0x10] sm:$0xff]  ;;  %vm283_vm1 = vcmask 1043456  }
  0x1c   : > { %272 = vmatpush.msra.mxu1 %v229_v2  ;;  %v225_v6 = vld [vmem:[%s182_s18 + $0x18] sm:$0xff]  ;;  %v230_v7 = vld [vmem:[%s659_s2] sm:$0x7]  ;;  %v223_v9 = vld [vmem:[%s182_s18 + $0x8] sm:$0xff]  ;;  %s671_s15 = smov (!%p212_p13, %s530_s15), 1 }
  0x1d   : > { %253 = vmatpush.msra.mxu0 %v226_v3  ;;  %v222_v8 = vld [vmem:[%s182_s18] sm:$0xff]  ;;  %233 = vperm.xlu0 %457, %v230_v7   ;;  %s398_s25 = sshll.u32 %s671_s15, 3 }
  0x1e   : > { %273 = vmatpush.msra.mxu1 %v227_v4  ;;  %v221_v10 = vld [vmem:[%s658_s1] sm:$0x7]  ;;  %s219_s28 = scalar_lea.vmem %s660_s3, %s398_s25 }
  0x1f   : > { %254 = vmatpush.msra.mxu0 %v224_v5 }
  0x20   : > { %274 = vmatpush.msra.mxu1 %v225_v6 }
  0x21   : > { %255 = vmatpush.msra.mxu0 %v222_v8 }
  0x22   : > { %275 = vmatpush.msra.mxu1 %v223_v9  ;;  %393 = vmatmul.msk.f32.vlgmr.msra.gmra.mxu0 %vm236_vm0, %v221_v10 }
  0x23   : > { %394 = vmatmul.msk.f32.vlgmr.msra.gmra.mxu1 %vm236_vm0, %v221_v10 }
  0x8f   : > { %v234_v11 = vpop.permute.xlu0 %233 }
  0x9f   : > { %v257_v12 = vpop.f32.mrf.mxu0 }
  0xa0   : > { %v277_v13 = vpop.f32.mrf.mxu1  ;;  %v258_v15 = vadd.f32 %v257_v12, %v234_v11 }
  0xa1   : > { %v278_v14 = vadd.f32 %v277_v13, %v234_v11 }
  0xa3   : > { %v282_v16 = vrot.slane %v278_v14, 4 }
  0xa5   : > { %v284_v17 = vsel %vm283_vm1, %v258_v15, %v282_v16 }
  0xa6   : > { %286 = vst [vmem:[%s219_s28] sm:$0x77] %v284_v17 }
  0xa7 PF: > { %s16_s17 = sadd.s32 1, %s538_s17   ;;  %s663_s12 = smov %s522_s13 }
  0xa8   : > { %p13_p0 = scmp.ge.s32.totalorder %s16_s17, 4   ;;  %s664_s13 = smov %s526_s14 }
  0xa9   : > { %s665_s14 = smov %s612_s24  ;;  %s666_s15 = smov %s534_s16 }
  0xaa   : > { %s667_s16 = smov %s669_s19  ;;  %15 = sbr.rel (!%p13_p0) target bundleno = 4 (0x4), region = 72 }
  0xaf   :  { %317 = vsyncpa [#allocation3], 1 }
  0xb0   :  { %319 = vsyncpa [#allocation3 + $0x1], 1 }

</bundles_post_ra>
